<compile_context>
chip_gen: v7x
topology: tpu7x:2x2x1
jax: 0.10.0
libtpu: 0.0.40
codegen_flags: <defaults>
</compile_context>

<pallas_src>
from functools import partial

import jax
import jax.numpy as jnp
from jax import lax
from jax.experimental import pallas as pl
from jax.experimental.pallas import tpu as pltpu

BN_EPS = 1e-5
HP = 128  # lane-dense padded hidden width (hidden_layer sizes must be <= 128)


def _round_up(a, m):
    return (a + m - 1) // m * m


# ----------------------------------------------------------------------------- kernels
def _fnn3_single_kernel(x_ref, slab_ref, w1_ref, w2_ref, w3_ref, o_ref, *, true_b):
    """Whole batch in one tile: full-batch BN statistics are available locally,
    so the entire forward pass runs in a single grid step."""
    tb = x_ref.shape[0]
    rows = lax.broadcasted_iota(jnp.int32, (tb, 1), 0)
    valid = rows < true_b                               # mask padded batch rows
    inv_b = jnp.float32(1.0 / true_b)

    b1 = slab_ref[0:1, :HP]
    g1 = slab_ref[1:2, :HP]
    be1 = slab_ref[2:3, :HP]
    b2 = slab_ref[3:4, :HP]
    g2 = slab_ref[4:5, :HP]
    be2 = slab_ref[5:6, :HP]
    b3 = slab_ref[6:7, :]

    def bn_relu(h, g, be):
        hm = jnp.where(valid, h, 0.0)
        mu = jnp.sum(hm, axis=0, keepdims=True) * inv_b
        var = jnp.sum(hm * hm, axis=0, keepdims=True) * inv_b - mu * mu
        scale = g * lax.rsqrt(var + BN_EPS)
        return jnp.maximum(h * scale + (be - mu * scale), 0.0)

    h1 = jnp.dot(x_ref[...], w1_ref[...], preferred_element_type=jnp.float32) + b1
    a1 = bn_relu(h1, g1, be1)
    h2 = jnp.dot(a1.astype(w2_ref.dtype), w2_ref[...],
                 preferred_element_type=jnp.float32) + b2
    a2 = bn_relu(h2, g2, be2)
    out = jnp.dot(a2.astype(w3_ref.dtype), w3_ref[...],
                  preferred_element_type=jnp.float32) + b3
    o_ref[...] = out.astype(o_ref.dtype)                # lane-dense 128-wide store


def _fnn3_phased_kernel(x_ref, slab_ref, w1_ref, w2_ref, w3_ref, o_ref,
                        stats_ref, *maybe_stage, true_b, tile_b, use_stage):
    """Grid = (phase, batch_tile), tile fastest.  Phases:
         0: Linear1, stage h1 (if use_stage), accumulate BN1 sum/sumsq over full batch
         1: finalize BN1 (tile 0), BN1+ReLU, Linear2, restage h2, accumulate BN2 stats
         2: finalize BN2 (tile 0), BN2+ReLU, Linear3, write output tiles
       stats_ref rows: 0 sum1, 1 sumsq1, 2 sum2, 3 sumsq2, 4 scale1, 5 shift1, 6 scale2, 7 shift2.
       maybe_stage = (stage_ref,) when use_stage: persistent (nbt, tb, HP) f32 VMEM scratch
       holding h1 during phase 0->1 and h2 during phase 1->2 (overwritten in place)."""
    stage_ref = maybe_stage[0] if use_stage else None
    phase = pl.program_id(0)
    tile = pl.program_id(1)
    inv_b = jnp.float32(1.0 / true_b)

    # Mask for padded batch rows (excluded from BN statistics).
    rows = lax.broadcasted_iota(jnp.int32, (tile_b, 1), 0) + tile * tile_b
    valid = rows < true_b

    # Packed per-feature params (single (8, slab_w) slab -> single DMA).
    b1 = slab_ref[0:1, :HP]
    g1 = slab_ref[1:2, :HP]
    be1 = slab_ref[2:3, :HP]
    b2 = slab_ref[3:4, :HP]
    g2 = slab_ref[4:5, :HP]
    be2 = slab_ref[5:6, :HP]
    b3 = slab_ref[6:7, :]

    def linear1():
        return jnp.dot(x_ref[...], w1_ref[...],
                       preferred_element_type=jnp.float32) + b1

    def linear2(h1):
        a1 = jnp.maximum(h1 * stats_ref[4:5, :] + stats_ref[5:6, :], 0.0)
        return jnp.dot(a1.astype(w2_ref.dtype), w2_ref[...],
                       preferred_element_type=jnp.float32) + b2

    # ---- phase 0: Linear1 + BN1 statistics ------------------------------------------
    @pl.when(phase == 0)
    def _phase0():
        @pl.when(tile == 0)
        def _init():
            stats_ref[...] = jnp.zeros_like(stats_ref)
        h1 = linear1()
        if use_stage:
            stage_ref[tile] = h1                        # stage h1 for phases 1/2
        h1m = jnp.where(valid, h1, 0.0)
        stats_ref[0:1, :] += jnp.sum(h1m, axis=0, keepdims=True)
        stats_ref[1:2, :] += jnp.sum(h1m * h1m, axis=0, keepdims=True)

    # ---- phase 1: finalize BN1, Linear2 + BN2 statistics -----------------------------
    @pl.when(phase == 1)
    def _phase1():
        @pl.when(tile == 0)
        def _fin1():
            mu = stats_ref[0:1, :] * inv_b
            var = stats_ref[1:2, :] * inv_b - mu * mu   # biased batch variance
            scale = g1 * lax.rsqrt(var + BN_EPS)
            stats_ref[4:5, :] = scale
            stats_ref[5:6, :] = be1 - mu * scale
            stats_ref[2:3, :] = jnp.zeros_like(mu)      # reset BN2 accumulators
            stats_ref[3:4, :] = jnp.zeros_like(mu)
        h1 = stage_ref[tile] if use_stage else linear1()
        h2 = linear2(h1)
        if use_stage:
            stage_ref[tile] = h2                        # overwrite: h1 no longer needed
        h2m = jnp.where(valid, h2, 0.0)
        stats_ref[2:3, :] += jnp.sum(h2m, axis=0, keepdims=True)
        stats_ref[3:4, :] += jnp.sum(h2m * h2m, axis=0, keepdims=True)

    # ---- phase 2: finalize BN2, Linear3, write output --------------------------------
    @pl.when(phase == 2)
    def _phase2():
        @pl.when(tile == 0)
        def _fin2():
            mu2 = stats_ref[2:3, :] * inv_b
            var2 = stats_ref[3:4, :] * inv_b - mu2 * mu2
            scale2 = g2 * lax.rsqrt(var2 + BN_EPS)
            stats_ref[6:7, :] = scale2
            stats_ref[7:8, :] = be2 - mu2 * scale2
        if use_stage:
            h2 = stage_ref[tile]
        else:
            h2 = linear2(linear1())
        a2 = jnp.maximum(h2 * stats_ref[6:7, :] + stats_ref[7:8, :], 0.0)
        out = jnp.dot(a2.astype(w3_ref.dtype), w3_ref[...],
                      preferred_element_type=jnp.float32) + b3
        o_ref[...] = out.astype(o_ref.dtype)            # lane-dense 128-wide store


# ----------------------------------------------------------------------------- wrapper
def pack_params(params):
    """Zero-pad weights to lane-dense shapes and pack all small per-feature vectors
    into a single (8, slab_w) f32 slab (one DMA instead of eight)."""
    w1, b1, g1, be1, w2, b2, g2, be2, w3, b3 = [p.astype(jnp.float32) for p in params]
    d_in, h1 = w1.shape
    h2 = w2.shape[1]
    n_out = w3.shape[1]
    assert h1 <= HP and h2 <= HP, "hidden sizes must be <= 128 for this packing"
    out_p = _round_up(max(n_out, 1), 128)
    slab_w = max(HP, out_p)

    w1p = jnp.zeros((d_in, HP), jnp.float32).at[:, :h1].set(w1)
    w2p = jnp.zeros((HP, HP), jnp.float32).at[:h1, :h2].set(w2)
    w3p = jnp.zeros((HP, out_p), jnp.float32).at[:h2, :n_out].set(w3)

    slab = jnp.zeros((8, slab_w), jnp.float32)
    slab = slab.at[0, :h1].set(b1)
    slab = slab.at[1, :h1].set(g1)
    slab = slab.at[2, :h1].set(be1)
    slab = slab.at[3, :h2].set(b2)
    slab = slab.at[4, :h2].set(g2)
    slab = slab.at[5, :h2].set(be2)
    slab = slab.at[6, :n_out].set(b3)
    return w1p, w2p, w3p, slab, n_out


def fnn3_forward(x, w1p, w2p, w3p, slab, n_out, *, tile_b=None,
                 vmem_budget_bytes=32 << 20, stage_budget_bytes=16 << 20,
                 compute_dtype=jnp.float32):
    """x: (B, C, H, W) or (B, D).  Returns (B, n_out) float32.
    compute_dtype=jnp.bfloat16 feeds the MXU bf16 inputs with f32 accumulation
    (faster, slight deviation from strict f32 PyTorch parity)."""
    B = x.shape[0]
    x2d = x.reshape(B, -1).astype(compute_dtype)        # nn.Flatten + single cast
    d_in = x2d.shape[1]
    out_p = w3p.shape[1]
    slab_w = slab.shape[1]
    esize = jnp.dtype(compute_dtype).itemsize

    w1c = w1p.astype(compute_dtype)
    w2c = w2p.astype(compute_dtype)
    w3c = w3p.astype(compute_dtype)

    # --- tile_b derived from d_in / out width and an explicit VMEM budget -------------
    b8 = _round_up(B, 8)
    # resident weights (double-buffer conservative) + slab + stats
    fixed = (2 * d_in * HP + 2 * HP * HP + 2 * HP * out_p) * esize \
            + 2 * 8 * slab_w * 4 + 8 * HP * 4
    per_row = 2 * d_in * esize + 2 * out_p * 4          # streamed x + out double-buffers
    avail = max(vmem_budget_bytes - fixed, 1 << 20)
    tb_cap = max(8, min((avail // per_row) // 8 * 8, 2048))
    tb = min(b8, tb_cap) if tile_b is None else min(_round_up(max(tile_b, 8), 8), b8)
    nbt = -(-B // tb)
    b_pad = nbt * tb
    if b_pad != B:
        x2d = jnp.pad(x2d, ((0, b_pad - B), (0, 0)))    # padded rows masked in-kernel

    # --- fast path: whole batch in one tile -> single grid step -----------------------
    if nbt == 1:
        est = fixed + b_pad * (d_in * esize + out_p * 4 + 2 * HP * 4)
        vmem_limit = int(min(max(2 * est, 32 << 20), 56 << 20))
        out = pl.pallas_call(
            partial(_fnn3_single_kernel, true_b=B),
            out_shape=jax.ShapeDtypeStruct((b_pad, out_p), jnp.float32),
            compiler_params=pltpu.CompilerParams(vmem_limit_bytes=vmem_limit),
        )(x2d, slab, w1c, w2c, w3c)
        return out[:B, :n_out]

    # --- multi-tile 3-phase path -------------------------------------------------------
    stage_bytes = b_pad * HP * 4
    use_stage = stage_bytes <= min(stage_budget_bytes,
                                   max(vmem_budget_bytes - fixed - tb * per_row, 0))
    est = fixed + tb * per_row + (stage_bytes if use_stage else 0)
    vmem_limit = int(min(max(2 * est, 32 << 20), 56 << 20))

    if use_stage:
        # x is consumed only in phase 0; pin its block at the last tile afterwards so
        # no x re-DMA happens during phases 1/2.
        def x_map(p, i):
            m = (p + 1) // 2                            # 0 in phase 0, 1 in phases 1/2
            return (i * (1 - m) + (nbt - 1) * m, 0)
    else:
        # Fallback recompute path (staging scratch would not fit VMEM budget).
        def x_map(p, i):
            return (i, 0)

    # Output block index only advances during phase 2, so each block is written back
    # exactly once with real data.  NOTE: relies on Pallas flushing an output block only
    # when its block index changes; block 0 is never flushed during phases 0/1, where
    # the kernel does not write o_ref.
    def o_map(p, i):
        return (i * (p // 2), 0)

    scratch = [pltpu.VMEM((8, HP), jnp.float32)]        # BN sum/sumsq + scale/shift
    if use_stage:
        scratch.append(pltpu.VMEM((nbt, tb, HP), jnp.float32))   # h1/h2 staging

    kernel = partial(_fnn3_phased_kernel, true_b=B, tile_b=tb, use_stage=use_stage)

    out = pl.pallas_call(
        kernel,
        out_shape=jax.ShapeDtypeStruct((b_pad, out_p), jnp.float32),
        grid_spec=pltpu.PrefetchScalarGridSpec(
            num_scalar_prefetch=0,
            grid=(3, nbt),                              # (phase, batch tile)
            in_specs=[
                pl.BlockSpec((tb, d_in), x_map),            # x tile (phase-0 stream)
                pl.BlockSpec((8, slab_w), lambda p, i: (0, 0)),   # packed small params
                pl.BlockSpec((d_in, HP), lambda p, i: (0, 0)),    # W1 (resident)
                pl.BlockSpec((HP, HP), lambda p, i: (0, 0)),      # W2 (resident)
                pl.BlockSpec((HP, out_p), lambda p, i: (0, 0)),   # W3 (resident)
            ],
            out_specs=pl.BlockSpec((tb, out_p), o_map),
            scratch_shapes=scratch,
        ),
        # Batch axis accumulates into shared BN scratch -> must stay "arbitrary".
        # TODO(synk): per-core partial sums + cross-core combine to mark it "parallel"
        # on v7x megacore.
        compiler_params=pltpu.CompilerParams(
            dimension_semantics=("arbitrary", "arbitrary"),
            vmem_limit_bytes=vmem_limit),
    )(x2d, slab, w1c, w2c, w3c)

    return out[:B, :n_out]


# ------------------------------------------------------------------------ init / reference
def init_params(key, input_size, output_size, hidden_layer1=15, hidden_layer2=15):
    """PyTorch-like init: Linear weights/biases ~ U(-1/sqrt(fan_in), 1/sqrt(fan_in)),
    BatchNorm1d gamma=1, beta=0.  Weights stored as (in, out); vectors stored 1-D."""
    ks = jax.random.split(key, 6)

    def linear(kw, kb, fan_in, fan_out):
        bound = 1.0 / jnp.sqrt(jnp.float32(fan_in))
        w = jax.random.uniform(kw, (fan_in, fan_out), jnp.float32, -bound, bound)
        b = jax.random.uniform(kb, (fan_out,), jnp.float32, -bound, bound)
        return w, b

    w1, b1 = linear(ks[0], ks[1], input_size, hidden_layer1)
    w2, b2 = linear(ks[2], ks[3], hidden_layer1, hidden_layer2)
    w3, b3 = linear(ks[4], ks[5], hidden_layer2, output_size)
    g1 = jnp.ones((hidden_layer1,), jnp.float32)
    be1 = jnp.zeros((hidden_layer1,), jnp.float32)
    g2 = jnp.ones((hidden_layer2,), jnp.float32)
    be2 = jnp.zeros((hidden_layer2,), jnp.float32)
    return (w1, b1, g1, be1, w2, b2, g2, be2, w3, b3)


def _reference_forward(x, params):
    """Pure-JAX reference (same math as PyTorch FNN3 in training mode)."""
    B = x.shape[0]
    h = x.reshape(B, -1).astype(jnp.float32)
    w1, b1, g1, be1, w2, b2, g2, be2, w3, b3 = params

    def bn(h, g, be):
        mu = jnp.mean(h, axis=0, keepdims=True)
        var = jnp.mean((h - mu) ** 2, axis=0, keepdims=True)
        return (h - mu) / jnp.sqrt(var + BN_EPS) * g + be

    h = jnp.maximum(bn(h @ w1 + b1, g1, be1), 0.0)
    h = jnp.maximum(bn(h @ w2 + b2, g2, be2), 0.0)
    return h @ w3 + b3


if __name__ == "__main__":
    # Small shapes: batch=40, input (4,4,4) -> input_size=64, hidden 15/15, output 10.
    B, C, H, W = 40, 4, 4, 4
    input_size = C * H * W
    output_size = 10

    key = jax.random.PRNGKey(0)
    kx, kp = jax.random.split(key)
    x = jax.random.normal(kx, (B, C, H, W), jnp.float32)
    params = init_params(kp, input_size, output_size, hidden_layer1=15, hidden_layer2=15)
    ref = _reference_forward(x, params)

    w1p, w2p, w3p, slab, n_out = pack_params(params)

    # 1) Default: derived tile_b covers the whole batch -> single-step fast path.
    out1 = jax.block_until_ready(fnn3_forward(x, w1p, w2p, w3p, slab, n_out))
    assert out1.shape == (B, output_size)
    assert jnp.allclose(out1, ref, atol=2e-4, rtol=2e-4), "single-step path mismatch"

    # 2) Forced multi-tile (3 phases x 3 batch tiles) with VMEM h1/h2 staging.
    out2 = jax.block_until_ready(fnn3_forward(x, w1p, w2p, w3p, slab, n_out, tile_b=16))
    assert jnp.allclose(out2, ref, atol=2e-4, rtol=2e-4), "staged multi-tile mismatch"

    # 3) Forced recompute fallback (zero staging budget).
    out3 = jax.block_until_ready(
        fnn3_forward(x, w1p, w2p, w3p, slab, n_out, tile_b=16, stage_budget_bytes=0))
    assert jnp.allclose(out3, ref, atol=2e-4, rtol=2e-4), "recompute fallback mismatch"

    # 4) bf16 MXU inputs with f32 accumulation (looser tolerance vs f32 reference).
    out4 = jax.block_until_ready(
        fnn3_forward(x, w1p, w2p, w3p, slab, n_out, tile_b=16,
                     compute_dtype=jnp.bfloat16))
    assert jnp.allclose(out4, ref, atol=5e-2, rtol=5e-2), "bf16 path mismatch"

    print("KERNEL_OK")
</pallas_src>

<mosaic_0001>
module attributes {stable_mosaic.version = 11 : i64} {
  func.func @_fnn3_single_kernel(%arg0: memref<40x64xf32, #tpu.memory_space<vmem>>, %arg1: memref<8x128xf32, #tpu.memory_space<vmem>>, %arg2: memref<64x128xf32, #tpu.memory_space<vmem>>, %arg3: memref<128x128xf32, #tpu.memory_space<vmem>>, %arg4: memref<128x128xf32, #tpu.memory_space<vmem>>, %arg5: memref<40x128xf32, #tpu.memory_space<vmem>>) attributes {dimension_semantics = [], scalar_prefetch = 0 : i64, scratch_operands = 0 : i64, tpu.core_type = #tpu.core_type<tc>} {
    %0 = tpu.iota {dimensions = array<i32: 0>} : vector<40x1xi32>
    %c40_i32 = arith.constant 40 : i32
    %1 = vector.broadcast %c40_i32 : i32 to vector<40x1xi32>
    %2 = arith.cmpi slt, %0, %1 : vector<40x1xi32>
    %c0 = arith.constant 0 : index
    %c0_0 = arith.constant 0 : index
    %3 = vector.load %arg1[%c0, %c0_0] : memref<8x128xf32, #tpu.memory_space<vmem>>, vector<1x128xf32>
    %c1 = arith.constant 1 : index
    %c0_1 = arith.constant 0 : index
    %4 = vector.load %arg1[%c1, %c0_1] : memref<8x128xf32, #tpu.memory_space<vmem>>, vector<1x128xf32>
    %c2 = arith.constant 2 : index
    %c0_2 = arith.constant 0 : index
    %5 = vector.load %arg1[%c2, %c0_2] : memref<8x128xf32, #tpu.memory_space<vmem>>, vector<1x128xf32>
    %c3 = arith.constant 3 : index
    %c0_3 = arith.constant 0 : index
    %6 = vector.load %arg1[%c3, %c0_3] : memref<8x128xf32, #tpu.memory_space<vmem>>, vector<1x128xf32>
    %c4 = arith.constant 4 : index
    %c0_4 = arith.constant 0 : index
    %7 = vector.load %arg1[%c4, %c0_4] : memref<8x128xf32, #tpu.memory_space<vmem>>, vector<1x128xf32>
    %c5 = arith.constant 5 : index
    %c0_5 = arith.constant 0 : index
    %8 = vector.load %arg1[%c5, %c0_5] : memref<8x128xf32, #tpu.memory_space<vmem>>, vector<1x128xf32>
    %c6 = arith.constant 6 : index
    %c0_6 = arith.constant 0 : index
    %9 = vector.load %arg1[%c6, %c0_6] : memref<8x128xf32, #tpu.memory_space<vmem>>, vector<1x128xf32>
    %c0_7 = arith.constant 0 : index
    %c0_8 = arith.constant 0 : index
    %10 = vector.load %arg0[%c0_7, %c0_8] : memref<40x64xf32, #tpu.memory_space<vmem>>, vector<40x64xf32>
    %c0_9 = arith.constant 0 : index
    %c0_10 = arith.constant 0 : index
    %11 = vector.load %arg2[%c0_9, %c0_10] : memref<64x128xf32, #tpu.memory_space<vmem>>, vector<64x128xf32>
    %cst = arith.constant dense<0.000000e+00> : vector<40x128xf32>
    %12 = tpu.matmul %10, %11, %cst {dimension_numbers = #tpu.dot_dimension_numbers<[1], [0], [0], [1], [0, 0, 1, 1], [], []>} : vector<40x64xf32>, vector<64x128xf32>, vector<40x128xf32> -> vector<40x128xf32>
    %13 = vector.broadcast %3 : vector<1x128xf32> to vector<40x128xf32>
    %14 = arith.addf %12, %13 : vector<40x128xf32>
    %cst_11 = arith.constant 0.000000e+00 : f32
    %15 = vector.shape_cast %2 : vector<40x1xi1> to vector<40x1xi1>
    %16 = vector.broadcast %15 : vector<40x1xi1> to vector<40x128xi1>
    %17 = vector.broadcast %cst_11 : f32 to vector<40x128xf32>
    %18 = arith.select %16, %14, %17 : vector<40x128xi1>, vector<40x128xf32>
    %cst_12 = arith.constant dense<0.000000e+00> : vector<128xf32>
    %19 = vector.multi_reduction <add>, %18, %cst_12 [0] : vector<40x128xf32> to vector<128xf32>
    %20 = vector.shape_cast %19 : vector<128xf32> to vector<1x128xf32>
    %cst_13 = arith.constant 2.500000e-02 : f32
    %21 = vector.broadcast %cst_13 : f32 to vector<1x128xf32>
    %22 = arith.mulf %20, %21 : vector<1x128xf32>
    %23 = arith.mulf %18, %18 : vector<40x128xf32>
    %cst_14 = arith.constant dense<0.000000e+00> : vector<128xf32>
    %24 = vector.multi_reduction <add>, %23, %cst_14 [0] : vector<40x128xf32> to vector<128xf32>
    %25 = vector.shape_cast %24 : vector<128xf32> to vector<1x128xf32>
    %cst_15 = arith.constant 2.500000e-02 : f32
    %26 = vector.broadcast %cst_15 : f32 to vector<1x128xf32>
    %27 = arith.mulf %25, %26 : vector<1x128xf32>
    %28 = arith.mulf %22, %22 : vector<1x128xf32>
    %29 = arith.subf %27, %28 : vector<1x128xf32>
    %cst_16 = arith.constant 9.99999974E-6 : f32
    %30 = vector.broadcast %cst_16 : f32 to vector<1x128xf32>
    %31 = arith.addf %29, %30 : vector<1x128xf32>
    %32 = math.rsqrt %31 : vector<1x128xf32>
    %33 = arith.mulf %4, %32 : vector<1x128xf32>
    %34 = vector.broadcast %33 : vector<1x128xf32> to vector<40x128xf32>
    %35 = arith.mulf %14, %34 : vector<40x128xf32>
    %36 = arith.mulf %22, %33 : vector<1x128xf32>
    %37 = arith.subf %5, %36 : vector<1x128xf32>
    %38 = vector.broadcast %37 : vector<1x128xf32> to vector<40x128xf32>
    %39 = arith.addf %35, %38 : vector<40x128xf32>
    %cst_17 = arith.constant 0.000000e+00 : f32
    %40 = vector.broadcast %cst_17 : f32 to vector<40x128xf32>
    %41 = arith.maximumf %39, %40 : vector<40x128xf32>
    %c0_18 = arith.constant 0 : index
    %c0_19 = arith.constant 0 : index
    %42 = vector.load %arg3[%c0_18, %c0_19] : memref<128x128xf32, #tpu.memory_space<vmem>>, vector<128x128xf32>
    %cst_20 = arith.constant dense<0.000000e+00> : vector<40x128xf32>
    %43 = tpu.matmul %41, %42, %cst_20 {dimension_numbers = #tpu.dot_dimension_numbers<[1], [0], [0], [1], [0, 0, 1, 1], [], []>} : vector<40x128xf32>, vector<128x128xf32>, vector<40x128xf32> -> vector<40x128xf32>
    %44 = vector.broadcast %6 : vector<1x128xf32> to vector<40x128xf32>
    %45 = arith.addf %43, %44 : vector<40x128xf32>
    %cst_21 = arith.constant 0.000000e+00 : f32
    %46 = vector.shape_cast %2 : vector<40x1xi1> to vector<40x1xi1>
    %47 = vector.broadcast %46 : vector<40x1xi1> to vector<40x128xi1>
    %48 = vector.broadcast %cst_21 : f32 to vector<40x128xf32>
    %49 = arith.select %47, %45, %48 : vector<40x128xi1>, vector<40x128xf32>
    %cst_22 = arith.constant dense<0.000000e+00> : vector<128xf32>
    %50 = vector.multi_reduction <add>, %49, %cst_22 [0] : vector<40x128xf32> to vector<128xf32>
    %51 = vector.shape_cast %50 : vector<128xf32> to vector<1x128xf32>
    %cst_23 = arith.constant 2.500000e-02 : f32
    %52 = vector.broadcast %cst_23 : f32 to vector<1x128xf32>
    %53 = arith.mulf %51, %52 : vector<1x128xf32>
    %54 = arith.mulf %49, %49 : vector<40x128xf32>
    %cst_24 = arith.constant dense<0.000000e+00> : vector<128xf32>
    %55 = vector.multi_reduction <add>, %54, %cst_24 [0] : vector<40x128xf32> to vector<128xf32>
    %56 = vector.shape_cast %55 : vector<128xf32> to vector<1x128xf32>
    %cst_25 = arith.constant 2.500000e-02 : f32
    %57 = vector.broadcast %cst_25 : f32 to vector<1x128xf32>
    %58 = arith.mulf %56, %57 : vector<1x128xf32>
    %59 = arith.mulf %53, %53 : vector<1x128xf32>
    %60 = arith.subf %58, %59 : vector<1x128xf32>
    %cst_26 = arith.constant 9.99999974E-6 : f32
    %61 = vector.broadcast %cst_26 : f32 to vector<1x128xf32>
    %62 = arith.addf %60, %61 : vector<1x128xf32>
    %63 = math.rsqrt %62 : vector<1x128xf32>
    %64 = arith.mulf %7, %63 : vector<1x128xf32>
    %65 = vector.broadcast %64 : vector<1x128xf32> to vector<40x128xf32>
    %66 = arith.mulf %45, %65 : vector<40x128xf32>
    %67 = arith.mulf %53, %64 : vector<1x128xf32>
    %68 = arith.subf %8, %67 : vector<1x128xf32>
    %69 = vector.broadcast %68 : vector<1x128xf32> to vector<40x128xf32>
    %70 = arith.addf %66, %69 : vector<40x128xf32>
    %cst_27 = arith.constant 0.000000e+00 : f32
    %71 = vector.broadcast %cst_27 : f32 to vector<40x128xf32>
    %72 = arith.maximumf %70, %71 : vector<40x128xf32>
    %c0_28 = arith.constant 0 : index
    %c0_29 = arith.constant 0 : index
    %73 = vector.load %arg4[%c0_28, %c0_29] : memref<128x128xf32, #tpu.memory_space<vmem>>, vector<128x128xf32>
    %cst_30 = arith.constant dense<0.000000e+00> : vector<40x128xf32>
    %74 = tpu.matmul %72, %73, %cst_30 {dimension_numbers = #tpu.dot_dimension_numbers<[1], [0], [0], [1], [0, 0, 1, 1], [], []>} : vector<40x128xf32>, vector<128x128xf32>, vector<40x128xf32> -> vector<40x128xf32>
    %75 = vector.broadcast %9 : vector<1x128xf32> to vector<40x128xf32>
    %76 = arith.addf %74, %75 : vector<40x128xf32>
    %c0_31 = arith.constant 0 : index
    %c0_32 = arith.constant 0 : index
    %77 = vector.load %arg5[%c0_31, %c0_32] : memref<40x128xf32, #tpu.memory_space<vmem>>, vector<40x128xf32>
    tpu.vector_store %arg5[%c0_31, %c0_32], %76 {strides = array<i32>} : memref<40x128xf32, #tpu.memory_space<vmem>>, vector<40x128xf32>,
    return
  }
}

</mosaic_0001>

<bundles_post_ra>
// kernel: tpu_custom_call.1
= control target key start
LH: loop header
LB: loop body
LE: loop exit
PB: predicated region body
PF: predicated region fallthrough
CT: control target
= control target key end

     0   :  { %10 = vsyncpa [#allocation3], 0  ;;  %s1193_s0 = inlined_call_operand.hbm [shape: f32[40,64], index: 0, kind: input, shape index: {}]   ;;  %s1194_s1 = inlined_call_operand.hbm [shape: f32[8,128], index: 1, kind: input, shape index: {}]   ;;  %s1195_s2 = inlined_call_operand.hbm [shape: f32[64,128], index: 2, kind: input, shape index: {}]   ;;  %s1196_s3 = inlined_call_operand.hbm [shape: f32[128,128], index: 3, kind: input, shape index: {}]   ;;  %s1197_s4 = inlined_call_operand.hbm [shape: f32[128,128], index: 4, kind: input, shape index: {}]   ;;  %s1198_s5 = inlined_call_operand.hbm [shape: f32[40,128], index: 5, kind: output, shape index: {}]  }
   0x1   :  { %11 = vsyncpa [#allocation6], 0 }
   0x2   :  { %12 = vsyncpa [#allocation9], 0 }
   0x3   :  { %13 = vsyncpa [#allocation4], 0  ;;  %s1009_s18 = smov [#allocation5]   ;;  %s869_s22 = scalar_lea.hbm %s1194_s1, 128 }
   0x4   :  { %s32_s19 = sshll.u32 %s1009_s18, 4  ;;  %p870_p0 = scmp.ne.s32.totalorder %s1194_s1, %s869_s22  ;;  %s33_s19 = int_to_ptr.vmem [resolvable:$true] %s32_s19 }
   0x5   :  { %p873_p1 = scmp.lt.u32.totalorder %s869_s22, %s1194_s1 }
   0x7   :  { %p875_p2 = pnand %p873_p1, %p870_p0 }
   0x9   :  { %878 = shalt.err (!%p875_p2)
}
   0xa   :  { %s879_s27 = scalar_lea.vmem %s33_s19, 128  ;;  %p884_p4 = scmp.lt.s32.totalorder %s33_s19, %s33_s19 }
   0xb   :  { %p880_p3 = scmp.ne.s32.totalorder %s33_s19, %s879_s27  ;;  %p885_p5 = scmp.lt.s32.totalorder %s879_s27, %s879_s27 }
   0xd   :  { %p886_p6 = por %p885_p5, %p884_p4 }
   0xf   :  { %p887_p7 = pnand %p886_p6, %p880_p3 }
  0x11   :  { %890 = shalt.err (!%p887_p7)
}
  0x12   :  { %35 = dma.hbm_to_vmem [thread:$0]  %s1194_s1, 128, %s33_s19, [#allocation6]  }
  0x13   :  { %s1010_s30 = smov [#allocation8]   ;;  %s1011_s7 = smov [#allocation2]  }
  0x14   :  { %s53_s6 = sshll.u32 %s1010_s30, 4  ;;  %s19_s8 = sshll.u32 %s1011_s7, 4  ;;  %s54_s6 = int_to_ptr.vmem [resolvable:$true] %s53_s6  ;;  %s20_s8 = int_to_ptr.vmem [resolvable:$true] %s19_s8 }
  0x15   :  { %s891_s11 = scalar_lea.hbm %s1196_s3, 2048 }
  0x16   :  { %p892_p8 = scmp.ne.s32.totalorder %s1196_s3, %s891_s11  ;;  %p895_p9 = scmp.lt.u32.totalorder %s891_s11, %s1196_s3 }
  0x18   :  { %p897_p10 = pnand %p895_p9, %p892_p8 }
  0x1a   :  { %900 = shalt.err (!%p897_p10)
}
  0x1b   :  { %s901_s1 = scalar_lea.vmem %s54_s6, 2048  ;;  %p906_p12 = scmp.lt.s32.totalorder %s54_s6, %s54_s6 }
  0x1c   :  { %p902_p11 = scmp.ne.s32.totalorder %s54_s6, %s901_s1  ;;  %p907_p13 = scmp.lt.s32.totalorder %s901_s1, %s901_s1 }
  0x1e   :  { %p908_p0 = por %p907_p13, %p906_p12 }
  0x20   :  { %p909_p1 = pnand %p908_p0, %p902_p11 }
  0x22   :  { %912 = shalt.err (!%p909_p1)
}
  0x23   :  { %s1012_s16 = smov 128   ;;  %s1013_s17 = smov 8  }
  0x24   :  { %59 = dma.hbm_to_vmem [thread:$0]  %s1196_s3, 2048, %s54_s6, [#allocation9], %s1012_s16, %s1012_s16, %s1013_s17  }
  0x25   :  { %s913_s22 = scalar_lea.hbm %s1193_s0, 640 }
  0x26   :  { %p914_p2 = scmp.ne.s32.totalorder %s1193_s0, %s913_s22  ;;  %p917_p3 = scmp.lt.u32.totalorder %s913_s22, %s1193_s0 }
  0x28   :  { %p919_p4 = pnand %p917_p3, %p914_p2 }
  0x2a   :  { %922 = shalt.err (!%p919_p4)
}
  0x2b   :  { %s923_s27 = scalar_lea.vmem %s20_s8, 640  ;;  %p928_p6 = scmp.lt.s32.totalorder %s20_s8, %s20_s8 }
  0x2c   :  { %p924_p5 = scmp.ne.s32.totalorder %s20_s8, %s923_s27  ;;  %p929_p7 = scmp.lt.s32.totalorder %s923_s27, %s923_s27 }
  0x2e   :  { %p930_p8 = por %p929_p7, %p928_p6 }
  0x30   :  { %p931_p9 = pnand %p930_p8, %p924_p5 }
  0x32   :  { %934 = shalt.err (!%p931_p9)
}
  0x33   :  { %25 = dma.hbm_to_vmem [thread:$0]  %s1193_s0, 640, %s20_s8, [#allocation3], %s1012_s16, %s1012_s16, %s1013_s17  }
  0x34   :  { %s1014_s29 = smov [#allocation7]   ;;  %s1015_s6 = smov [#allocation10]  }
  0x35   :  { %s41_s30 = sshll.u32 %s1014_s29, 4  ;;  %s65_s7 = sshll.u32 %s1015_s6, 4  ;;  %s42_s30 = int_to_ptr.vmem [resolvable:$true] %s41_s30  ;;  %s66_s7 = int_to_ptr.vmem [resolvable:$true] %s65_s7 }
  0x36   :  { %s935_s11 = scalar_lea.hbm %s1195_s2, 1024 }
  0x37   :  { %p936_p10 = scmp.ne.s32.totalorder %s1195_s2, %s935_s11  ;;  %p939_p11 = scmp.lt.u32.totalorder %s935_s11, %s1195_s2 }
  0x39   :  { %p941_p12 = pnand %p939_p11, %p936_p10 }
  0x3b   :  { %944 = shalt.err (!%p941_p12)
}
  0x3c   :  { %s945_s0 = scalar_lea.vmem %s42_s30, 1024  ;;  %p950_p0 = scmp.lt.s32.totalorder %s42_s30, %s42_s30 }
  0x3d   :  { %p946_p13 = scmp.ne.s32.totalorder %s42_s30, %s945_s0  ;;  %p951_p1 = scmp.lt.s32.totalorder %s945_s0, %s945_s0 }
  0x3f   :  { %p952_p2 = por %p951_p1, %p950_p0 }
  0x41   :  { %p953_p3 = pnand %p952_p2, %p946_p13 }
  0x43   :  { %956 = shalt.err (!%p953_p3)
}
  0x44   :  { %47 = dma.hbm_to_vmem [thread:$0]  %s1195_s2, 1024, %s42_s30, [#allocation6], %s1012_s16, %s1012_s16, %s1013_s17  }
  0x45   :  { %s957_s20 = scalar_lea.hbm %s1197_s4, 2048 }
  0x46   :  { %p958_p4 = scmp.ne.s32.totalorder %s1197_s4, %s957_s20  ;;  %p961_p5 = scmp.lt.u32.totalorder %s957_s20, %s1197_s4 }
  0x48   :  { %p963_p6 = pnand %p961_p5, %p958_p4 }
  0x4a   :  { %966 = shalt.err (!%p963_p6)
}
  0x4b   :  { %s967_s25 = scalar_lea.vmem %s66_s7, 2048  ;;  %p972_p8 = scmp.lt.s32.totalorder %s66_s7, %s66_s7 }
  0x4c   :  { %p968_p7 = scmp.ne.s32.totalorder %s66_s7, %s967_s25  ;;  %p973_p9 = scmp.lt.s32.totalorder %s967_s25, %s967_s25 }
  0x4e   :  { %p974_p10 = por %p973_p9, %p972_p8 }
  0x50   :  { %p975_p11 = pnand %p974_p10, %p968_p7 }
  0x52   :  { %978 = shalt.err (!%p975_p11)
}
  0x53   :  { %71 = dma.hbm_to_vmem [thread:$0]  %s1197_s4, 2048, %s66_s7, [#allocation9], %s1012_s16, %s1012_s16, %s1013_s17  }
  0x54   :  { %1001 = dma.done.wait [#allocation3], 640  }
  0x55   :  { %1002 = vsyncadd [#allocation3], 4294966656 }
  0x56   :  { %1003 = dma.done.wait [#allocation6], 1152  }
  0x57   :  { %1004 = vsyncadd [#allocation6], 4294966144 }
  0x58   :  { %1005 = dma.done.wait [#allocation9], 4096  }
  0x59   :  { %1006 = vsyncadd [#allocation9], 4294963200  ;;  %v1016_v0 = vmov 0.0|0.0   ;;  %vm1017_vm0 = vmmov 0   ;;  %v1018_v1 = vmov 0.0   ;;  %v110_v2 = vld [vmem:[#allocation7] sm:$0xff] }
  0x5a   :  { %794 = vmatprep.subr.bf16.mxu0 %v1016_v0  ;;  %685 = vmatprep.mubr.msk.f32.mxu0 %vm1017_vm0, %v1018_v1  ;;  %v111_v3 = vld [vmem:[#allocation7 + $0x8] sm:$0xff]  ;;  %v112_v4 = vld [vmem:[#allocation7 + $0x10] sm:$0xff]  ;;  %v113_v6 = vld [vmem:[#allocation7 + $0x18] sm:$0xff]  ;;  %vm122_vm1 = vcmask 523264   ;;  %s1019_s4 = smov [#allocation11]  }
  0x5b   :  { %806 = vmatprep.subr.bf16.mxu1 %v1016_v0  ;;  %732 = vmatprep.mubr.msk.f32.mxu1 %vm1017_vm0, %v1018_v1  ;;  %v795_v5 = vpack.c.bf16 %v111_v3, %v110_v2  ;;  %v798_v7 = vpack.c.bf16 %v113_v6, %v112_v4  ;;  %v114_v8 = vld [vmem:[#allocation7 + $0x20] sm:$0xff]  ;;  %v115_v9 = vld [vmem:[#allocation7 + $0x28] sm:$0xff]  ;;  %v116_v11 = vld [vmem:[#allocation7 + $0x30] sm:$0xff]  ;;  %s592_s27 = sshll.u32 %s1019_s4, 4  ;;  %s593_s27 = int_to_ptr.vmem [resolvable:$true] %s592_s27 }
  0x5c   :  { %v801_v10 = vpack.c.bf16 %v115_v9, %v114_v8  ;;  %v117_v12 = vld [vmem:[#allocation7 + $0x38] sm:$0xff]  ;;  %v105_v14 = vld [vmem:[#allocation2] sm:$0xff]  ;;  %v107_v16 = vld [vmem:[#allocation2 + $0x10] sm:$0xff]  ;;  %s979_s3 = scalar_lea.vmem %s593_s27, 640  ;;  %p984_p13 = scmp.lt.s32.totalorder %s593_s27, %s593_s27 }
  0x5d   :  { %796 = vmatpush3.bf16.msra.mxu0 %v795_v5  ;;  %v804_v13 = vpack.c.bf16 %v117_v12, %v116_v11  ;;  %v106_v15 = vld [vmem:[#allocation2 + $0x8] sm:$0xff]  ;;  %v108_v17 = vld [vmem:[#allocation2 + $0x18] sm:$0xff]  ;;  %v109_v18 = vld [vmem:[#allocation2 + $0x20] sm:$0xff]  ;;  %p980_p12 = scmp.ne.s32.totalorder %s593_s27, %s979_s3  ;;  %p985_p0 = scmp.lt.s32.totalorder %s979_s3, %s979_s3 }
  0x5e   :  { %797 = vmatprep.subr.bf16.mxu0 %v1016_v0  ;;  %v300_v19 = vld [vmem:[#allocation8] sm:$0xff]  ;;  %v301_v20 = vld [vmem:[#allocation8 + $0x8] sm:$0xff]  ;;  %v302_v22 = vld [vmem:[#allocation8 + $0x10] sm:$0xff] }
  0x5f   :  { %v807_v21 = vpack.c.bf16 %v301_v20, %v300_v19  ;;  %v303_v23 = vld [vmem:[#allocation8 + $0x18] sm:$0xff]  ;;  %v304_v25 = vld [vmem:[#allocation8 + $0x20] sm:$0xff]  ;;  %v305_v26 = vld [vmem:[#allocation8 + $0x28] sm:$0xff]  ;;  %p986_p1 = por %p985_p0, %p984_p13 }
  0x60   :  { %v810_v24 = vpack.c.bf16 %v303_v23, %v302_v22  ;;  %v813_v27 = vpack.c.bf16 %v305_v26, %v304_v25  ;;  %v306_v28 = vld [vmem:[#allocation8 + $0x30] sm:$0xff]  ;;  %v307_v29 = vld [vmem:[#allocation8 + $0x38] sm:$0xff]  ;;  %v308_v31 = vld [vmem:[#allocation8 + $0x40] sm:$0xff] }
  0x61   :  { %799 = vmatpush3.bf16.msra.mxu0 %v798_v7  ;;  %808 = vmatpush3.bf16.msra.mxu1 %v807_v21  ;;  %v816_v30 = vpack.c.bf16 %v307_v29, %v306_v28  ;;  %v309_v32 = vld [vmem:[#allocation8 + $0x48] sm:$0xff]  ;;  %v310_v34 = vld [vmem:[#allocation8 + $0x50] sm:$0xff]  ;;  %v311_v35 = vld [vmem:[#allocation8 + $0x58] sm:$0xff]  ;;  %p987_p2 = pnand %p986_p1, %p980_p12 }
  0x62   :  { %800 = vmatprep.subr.bf16.mxu0 %v1016_v0  ;;  %809 = vmatprep.subr.bf16.mxu1 %v1016_v0  ;;  %v819_v33 = vpack.c.bf16 %v309_v32, %v308_v31  ;;  %v822_v36 = vpack.c.bf16 %v311_v35, %v310_v34  ;;  %v312_v37 = vld [vmem:[#allocation8 + $0x60] sm:$0xff]  ;;  %v313_v38 = vld [vmem:[#allocation8 + $0x68] sm:$0xff]  ;;  %v314_v40 = vld [vmem:[#allocation8 + $0x70] sm:$0xff] }
  0x63   :  { %v825_v39 = vpack.c.bf16 %v313_v38, %v312_v37  ;;  %v315_v41 = vld [vmem:[#allocation8 + $0x78] sm:$0xff] }
  0x64   :  { %v828_v42 = vpack.c.bf16 %v315_v41, %v314_v40  ;;  %v606_v43 = vld [vmem:[#allocation5] ss:$0 sm:$0xff]  ;;  %v99_v29 = vld [vmem:[#allocation5 + $0x1] sm:$0x1] }
  0x65   :  { %802 = vmatpush3.bf16.msra.mxu0 %v801_v10  ;;  %811 = vmatpush3.bf16.msra.mxu1 %v810_v24 }
  0x66   :  { %803 = vmatprep.subr.bf16.mxu0 %v1016_v0  ;;  %812 = vmatprep.subr.bf16.mxu1 %v1016_v0 }
  0x69   :  { %805 = vmatpush3.bf16.msra.mxu0 %v804_v13  ;;  %814 = vmatpush3.bf16.msra.mxu1 %v813_v27  ;;  %v275_v27 = vlaneseq }
  0x6a   :  { %830 = vmatprep.subr.bf16.mxu0 %v1016_v0  ;;  %815 = vmatprep.subr.bf16.mxu1 %v1016_v0 }
  0x6b   :  { %v276_v28 = vshrl.u32 %v275_v27, 7 }
  0x6c   :  { %686 = vmatmul.mubr.msk.f32.vlgmr.msra.gmra.mrb[0].mxu0 %vm122_vm1, %v105_v14 }
  0x6d   :  { %688 = vmatprep.mubr.msk.f32.mxu0 %vm1017_vm0, %v1018_v1  ;;  %817 = vmatpush3.bf16.msra.mxu1 %v816_v30  ;;  %v1149_v30 = vsub.s32 0, %v276_v28 }
  0x6e   :  { %818 = vmatprep.subr.bf16.mxu1 %v1016_v0 }
  0x70   :  { %689 = vmatmul.mubr.msk.f32.gmra.mrb[2].mxu0 %vm122_vm1, %v106_v15 }
  0x71   :  { %691 = vmatprep.mubr.msk.f32.mxu0 %vm1017_vm0, %v1018_v1  ;;  %820 = vmatpush3.bf16.msra.mxu1 %v819_v33  ;;  %v100_v33 = vld [vmem:[#allocation5 + $0x2] sm:$0x1] }
  0x72   :  { %821 = vmatprep.subr.bf16.mxu1 %v1016_v0 }
  0x74   :  { %692 = vmatmul.mubr.msk.f32.gmra.mrb[4].mxu0 %vm122_vm1, %v107_v16 }
  0x75   :  { %694 = vmatprep.mubr.msk.f32.mxu0 %vm1017_vm0, %v1018_v1  ;;  %823 = vmatpush3.bf16.msra.mxu1 %v822_v36 }
  0x76   :  { %824 = vmatprep.subr.bf16.mxu1 %v1016_v0 }
  0x78   :  { %695 = vmatmul.mubr.msk.f32.gmra.mrb[6].mxu0 %vm122_vm1, %v108_v17 }
  0x79   :  { %697 = vmatprep.mubr.msk.f32.mxu0 %vm1017_vm0, %v1018_v1  ;;  %826 = vmatpush3.bf16.msra.mxu1 %v825_v39 }
  0x7a   :  { %827 = vmatprep.subr.bf16.mxu1 %v1016_v0 }
  0x7c   :  { %698 = vmatmul.mubr.msk.f32.gmra.mrb[8].mxu0 %vm122_vm1, %v109_v18 }
  0x7d   :  { %779 = vmatprep.mubr.msk.f32.mxu0 %vm1017_vm0, %v1018_v1  ;;  %829 = vmatpush3.bf16.msra.mxu1 %v828_v42 }
 0x13f   :  { %v204_v44 = vpop.f32.mrb[0].mxu0 }
 0x140   :  { %v687_v45 = vpop.f32.mrb[1].mxu0  ;;  %v205_v46 = vadd.f32 %v606_v43, %v204_v44 }
 0x142   :  { %v254_v50 = vmul.f32 %v205_v46, %v205_v46 }
 0x143   :  { %v209_v47 = vpop.f32.mrb[2].mxu0 }
 0x144   :  { %v210_v48 = vadd.f32 %v606_v43, %v209_v47  ;;  %v690_v49 = vpop.f32.mrb[3].mxu0 }
 0x146   :  { %v243_v51 = vadd.f32 %v210_v48, %v205_v46  ;;  %v255_v52 = vmul.f32 %v210_v48, %v210_v48 }
 0x147   :  { %v214_v53 = vpop.f32.mrb[4].mxu0 }
 0x148   :  { %v259_v54 = vadd.f32 %v255_v52, %v254_v50  ;;  %v215_v55 = vadd.f32 %v606_v43, %v214_v53  ;;  %v693_v56 = vpop.f32.mrb[5].mxu0  ;;  %v472_v53 = vld [vmem:[#allocation10] sm:$0xff] }
 0x149   :  { %v474_v56 = vld [vmem:[#allocation10 + $0x10] sm:$0xff] }
 0x14a   :  { %v244_v57 = vadd.f32 %v243_v51, %v215_v55  ;;  %v256_v58 = vmul.f32 %v215_v55, %v215_v55 }
 0x14b   :  { %v219_v59 = vpop.f32.mrb[6].mxu0 }
 0x14c   :  { %v260_v60 = vadd.f32 %v259_v54, %v256_v58  ;;  %v220_v61 = vadd.f32 %v606_v43, %v219_v59  ;;  %v696_v62 = vpop.f32.mrb[7].mxu0  ;;  %v473_v54 = vld [vmem:[#allocation10 + $0x8] sm:$0xff]  ;;  %v476_v59 = vld [vmem:[#allocation10 + $0x20] sm:$0xff] }
 0x14d   :  { %v478_v62 = vld [vmem:[#allocation10 + $0x30] sm:$0xff] }
 0x14e   :  { %v245_v63 = vadd.f32 %v244_v57, %v220_v61  ;;  %v257_v2 = vmul.f32 %v220_v61, %v220_v61  ;;  %v475_v57 = vld [vmem:[#allocation10 + $0x18] sm:$0xff] }
 0x14f   :  { %v224_v3 = vpop.f32.mrb[8].mxu0  ;;  %v834_v58 = vpack.c.bf16 %v475_v57, %v474_v56 }
 0x150   :  { %v261_v4 = vadd.f32 %v260_v60, %v257_v2  ;;  %v225_v5 = vadd.f32 %v606_v43, %v224_v3  ;;  %v699_v6 = vpop.f32.mrb[9].mxu0  ;;  %v477_v60 = vld [vmem:[#allocation10 + $0x28] sm:$0xff]  ;;  %v480_v3 = vld [vmem:[#allocation10 + $0x40] sm:$0xff] }
 0x151   :  { %v482_v6 = vld [vmem:[#allocation10 + $0x50] sm:$0xff] }
 0x152   :  { %v246_v7 = vadd.f32 %v245_v63, %v225_v5  ;;  %v258_v8 = vmul.f32 %v225_v5, %v225_v5  ;;  %v479_v63 = vld [vmem:[#allocation10 + $0x38] sm:$0xff] }
 0x153   :  { %v840_v2 = vpack.c.bf16 %v479_v63, %v478_v62 }
 0x154   :  { %v247_v9 = vrot.slane %v246_v7, 4  ;;  %v262_v10 = vadd.f32 %v261_v4, %v258_v8  ;;  %v481_v4 = vld [vmem:[#allocation10 + $0x48] sm:$0xff] }
 0x156   :  { %v248_v11 = vadd.f32 %v247_v9, %v246_v7  ;;  %v263_v12 = vrot.slane %v262_v10, 4  ;;  %v483_v7 = vld [vmem:[#allocation10 + $0x58] sm:$0xff]  ;;  %v484_v9 = vld [vmem:[#allocation10 + $0x60] sm:$0xff] }
 0x157   :  { %v846_v8 = vpack.c.bf16 %v483_v7, %v482_v6 }
 0x158   :  { %v249_v13 = vrot.slane %v248_v11, 2  ;;  %v264_v14 = vadd.f32 %v263_v12, %v262_v10  ;;  %v485_v10 = vld [vmem:[#allocation10 + $0x68] sm:$0xff]  ;;  %v486_v12 = vld [vmem:[#allocation10 + $0x70] sm:$0xff] }
 0x15a   :  { %v250_v15 = vadd.f32 %v249_v13, %v248_v11  ;;  %v265_v16 = vrot.slane %v264_v14, 2  ;;  %v849_v11 = vpack.c.bf16 %v485_v10, %v484_v9  ;;  %v487_v13 = vld [vmem:[#allocation10 + $0x78] sm:$0xff] }
 0x15c   :  { %v251_v17 = vrot.slane %v250_v15, 1  ;;  %v266_v18 = vadd.f32 %v265_v16, %v264_v14  ;;  %v852_v14 = vpack.c.bf16 %v487_v13, %v486_v12 }
 0x15e   :  { %v252_v19 = vadd.f32 %v251_v17, %v250_v15  ;;  %v267_v20 = vrot.slane %v266_v18, 1  ;;  %v612_v15 = vld [vmem:[#allocation5 + $0x3] ss:$0 sm:$0xff] }
 0x160   :  { %v253_v21 = vmul.f32 0.025, %v252_v19  ;;  %v268_v22 = vadd.f32 %v267_v20, %v266_v18 }
 0x162   :  { %v269_v23 = vmul.f32 0.025, %v268_v22  ;;  %v270_v24 = vmul.f32 %v253_v21, %v253_v21 }
 0x164   :  { %v271_v25 = vsub.f32 %v269_v23, %v270_v24 }
 0x166   :  { %v272_v26 = vadd.f32 1e-05, %v271_v25 }
 0x168   :  { %865 = vrsqrt.f32 %v272_v26 }
 0x172   :  { %v866_v31 = vpop.eup %865 }
 0x173   :  { %v274_v32 = vmul.f32 %v866_v31, %v99_v29 }
 0x175   :  { %v278_v34 = vrot.slane %v274_v32, %v1149_v30  ;;  %v284_v35 = vmul.f32 %v274_v32, %v253_v21 }
 0x177   :  { %v283_v36 = vmul.f32 %v278_v34, %v225_v5  ;;  %v285_v37 = vsub.f32 %v100_v33, %v284_v35  ;;  %v279_v38 = vmul.f32 %v278_v34, %v205_v46  ;;  %v280_v39 = vmul.f32 %v278_v34, %v210_v48 }
 0x178   :  { %v281_v40 = vmul.f32 %v278_v34, %v215_v55  ;;  %v282_v41 = vmul.f32 %v278_v34, %v220_v61  ;;  %v831_v55 = vpack.c.bf16 %v473_v54, %v472_v53  ;;  %v837_v61 = vpack.c.bf16 %v477_v60, %v476_v59 }
 0x179   :  { %v289_v42 = vrot.slane %v285_v37, %v1149_v30  ;;  %v843_v5 = vpack.c.bf16 %v481_v4, %v480_v3 }
 0x17a   :  { %832 = vmatpush3.bf16.msra.mxu0 %v831_v55 }
 0x17b   :  { %v290_v43 = vadd.f32 %v289_v42, %v279_v38  ;;  %v291_v44 = vadd.f32 %v289_v42, %v280_v39  ;;  %v292_v45 = vadd.f32 %v289_v42, %v281_v40  ;;  %v293_v47 = vadd.f32 %v289_v42, %v282_v41  ;;  %833 = vmatprep.subr.bf16.mxu0 %v1016_v0 }
 0x17c   :  { %v294_v49 = vadd.f32 %v289_v42, %v283_v36 }
 0x17d   :  { %v295_v50 = vmax.f32 %v290_v43, 0.0  ;;  %v296_v51 = vmax.f32 %v291_v44, 0.0  ;;  %v297_v46 = vmax.f32 %v292_v45, 0.0  ;;  %v298_v48 = vmax.f32 %v293_v47, 0.0 }
 0x17e   :  { %v299_v52 = vmax.f32 %v294_v49, 0.0  ;;  %835 = vmatpush3.bf16.msra.mxu0 %v834_v58 }
 0x17f   :  { %733 = vmatmul.mubr.f32.vlgmr.msra.gmra.mrb[0].mxu1 %v295_v50  ;;  %836 = vmatprep.subr.bf16.mxu0 %v1016_v0 }
 0x180   :  { %735 = vmatprep.mubr.msk.f32.mxu1 %vm1017_vm0, %v1018_v1 }
 0x182   :  { %838 = vmatpush3.bf16.msra.mxu0 %v837_v61  ;;  %v102_v61 = vld [vmem:[#allocation5 + $0x4] sm:$0x1] }
 0x183   :  { %736 = vmatmul.mubr.f32.gmra.mrb[2].mxu1 %v296_v51  ;;  %839 = vmatprep.subr.bf16.mxu0 %v1016_v0 }
 0x184   :  { %738 = vmatprep.mubr.msk.f32.mxu1 %vm1017_vm0, %v1018_v1 }
 0x186   :  { %841 = vmatpush3.bf16.msra.mxu0 %v840_v2  ;;  %v103_v2 = vld [vmem:[#allocation5 + $0x5] sm:$0x1] }
 0x187   :  { %739 = vmatmul.mubr.f32.gmra.mrb[4].mxu1 %v297_v46  ;;  %842 = vmatprep.subr.bf16.mxu0 %v1016_v0 }
 0x188   :  { %741 = vmatprep.mubr.msk.f32.mxu1 %vm1017_vm0, %v1018_v1 }
 0x18a   :  { %844 = vmatpush3.bf16.msra.mxu0 %v843_v5 }
 0x18b   :  { %742 = vmatmul.mubr.f32.gmra.mrb[6].mxu1 %v298_v48  ;;  %845 = vmatprep.subr.bf16.mxu0 %v1016_v0 }
 0x18c   :  { %744 = vmatprep.mubr.msk.f32.mxu1 %vm1017_vm0, %v1018_v1 }
 0x18e   :  { %847 = vmatpush3.bf16.msra.mxu0 %v846_v8 }
 0x18f   :  { %745 = vmatmul.mubr.f32.gmra.mrb[8].mxu1 %v299_v52  ;;  %848 = vmatprep.subr.bf16.mxu0 %v1016_v0 }
 0x192   :  { %850 = vmatpush3.bf16.msra.mxu0 %v849_v11 }
 0x193   :  { %851 = vmatprep.subr.bf16.mxu0 %v1016_v0 }
 0x196   :  { %853 = vmatpush3.bf16.msra.mxu0 %v852_v14 }
 0x252   :  { %v386_v16 = vpop.f32.mrb[0].mxu1 }
 0x253   :  { %v734_v17 = vpop.f32.mrb[1].mxu1  ;;  %v387_v18 = vadd.f32 %v612_v15, %v386_v16 }
 0x255   :  { %v426_v22 = vmul.f32 %v387_v18, %v387_v18 }
 0x256   :  { %v391_v19 = vpop.f32.mrb[2].mxu1 }
 0x257   :  { %v392_v20 = vadd.f32 %v612_v15, %v391_v19  ;;  %v737_v21 = vpop.f32.mrb[3].mxu1 }
 0x258   :  { %v613_v21 = vld [vmem:[#allocation5 + $0x6] ss:$0 sm:$0xff] }
 0x259   :  { %v415_v23 = vadd.f32 %v392_v20, %v387_v18  ;;  %v427_v24 = vmul.f32 %v392_v20, %v392_v20 }
 0x25a   :  { %v396_v25 = vpop.f32.mrb[4].mxu1 }
 0x25b   :  { %v431_v26 = vadd.f32 %v427_v24, %v426_v22  ;;  %v397_v27 = vadd.f32 %v612_v15, %v396_v25  ;;  %v740_v28 = vpop.f32.mrb[5].mxu1 }
 0x25d   :  { %v416_v29 = vadd.f32 %v415_v23, %v397_v27  ;;  %v428_v31 = vmul.f32 %v397_v27, %v397_v27 }
 0x25e   :  { %v401_v32 = vpop.f32.mrb[6].mxu1 }
 0x25f   :  { %v432_v0 = vadd.f32 %v431_v26, %v428_v31  ;;  %v402_v33 = vadd.f32 %v612_v15, %v401_v32  ;;  %v743_v34 = vpop.f32.mrb[7].mxu1 }
 0x261   :  { %v417_v35 = vadd.f32 %v416_v29, %v402_v33  ;;  %v429_v36 = vmul.f32 %v402_v33, %v402_v33 }
 0x262   :  { %v406_v37 = vpop.f32.mrb[8].mxu1 }
 0x263   :  { %v433_v38 = vadd.f32 %v432_v0, %v429_v36  ;;  %v407_v39 = vadd.f32 %v612_v15, %v406_v37  ;;  %v746_v40 = vpop.f32.mrb[9].mxu1 }
 0x265   :  { %v418_v41 = vadd.f32 %v417_v35, %v407_v39  ;;  %v430_v42 = vmul.f32 %v407_v39, %v407_v39 }
 0x267   :  { %v419_v43 = vrot.slane %v418_v41, 4  ;;  %v434_v44 = vadd.f32 %v433_v38, %v430_v42 }
 0x269   :  { %v420_v45 = vadd.f32 %v419_v43, %v418_v41  ;;  %v435_v47 = vrot.slane %v434_v44, 4 }
 0x26b   :  { %v421_v49 = vrot.slane %v420_v45, 2  ;;  %v436_v50 = vadd.f32 %v435_v47, %v434_v44 }
 0x26d   :  { %v422_v51 = vadd.f32 %v421_v49, %v420_v45  ;;  %v437_v46 = vrot.slane %v436_v50, 2 }
 0x26f   :  { %v423_v48 = vrot.slane %v422_v51, 1  ;;  %v438_v52 = vadd.f32 %v437_v46, %v436_v50 }
 0x271   :  { %v424_v53 = vadd.f32 %v423_v48, %v422_v51  ;;  %v439_v54 = vrot.slane %v438_v52, 1 }
 0x273   :  { %v425_v55 = vmul.f32 0.025, %v424_v53  ;;  %v440_v56 = vadd.f32 %v439_v54, %v438_v52 }
 0x275   :  { %v441_v57 = vmul.f32 0.025, %v440_v56  ;;  %v442_v58 = vmul.f32 %v425_v55, %v425_v55 }
 0x277   :  { %v443_v59 = vsub.f32 %v441_v57, %v442_v58 }
 0x279   :  { %v444_v60 = vadd.f32 1e-05, %v443_v59 }
 0x27b   :  { %867 = vrsqrt.f32 %v444_v60 }
 0x285   :  { %v868_v62 = vpop.eup %867 }
 0x286   :  { %v446_v63 = vmul.f32 %v868_v62, %v102_v61 }
 0x288   :  { %v450_v3 = vrot.slane %v446_v63, %v1149_v30  ;;  %v456_v4 = vmul.f32 %v446_v63, %v425_v55 }
 0x28a   :  { %v455_v5 = vmul.f32 %v450_v3, %v407_v39  ;;  %v457_v6 = vsub.f32 %v103_v2, %v456_v4  ;;  %v451_v7 = vmul.f32 %v450_v3, %v387_v18  ;;  %v452_v8 = vmul.f32 %v450_v3, %v392_v20 }
 0x28b   :  { %v453_v9 = vmul.f32 %v450_v3, %v397_v27  ;;  %v454_v10 = vmul.f32 %v450_v3, %v402_v33 }
 0x28c   :  { %v461_v11 = vrot.slane %v457_v6, %v1149_v30 }
 0x28e   :  { %v462_v12 = vadd.f32 %v461_v11, %v451_v7  ;;  %v463_v13 = vadd.f32 %v461_v11, %v452_v8  ;;  %v464_v14 = vadd.f32 %v461_v11, %v453_v9  ;;  %v465_v15 = vadd.f32 %v461_v11, %v454_v10 }
 0x28f   :  { %v466_v16 = vadd.f32 %v461_v11, %v455_v5 }
 0x290   :  { %v467_v17 = vmax.f32 %v462_v12, 0.0  ;;  %v468_v19 = vmax.f32 %v463_v13, 0.0  ;;  %v469_v18 = vmax.f32 %v464_v14, 0.0  ;;  %v470_v30 = vmax.f32 %v465_v15, 0.0 }
 0x291   :  { %v471_v20 = vmax.f32 %v466_v16, 0.0 }
 0x292   :  { %780 = vmatmul.mubr.f32.vlgmr.msra.gmra.mrb[10].mxu0 %v467_v17 }
 0x293   :  { %782 = vmatprep.mubr.msk.f32.mxu0 %vm1017_vm0, %v1018_v1 }
 0x296   :  { %783 = vmatmul.mubr.f32.gmra.mrb[12].mxu0 %v468_v19 }
 0x297   :  { %785 = vmatprep.mubr.msk.f32.mxu0 %vm1017_vm0, %v1018_v1 }
 0x29a   :  { %786 = vmatmul.mubr.f32.gmra.mrb[14].mxu0 %v469_v18 }
 0x29b   :  { %788 = vmatprep.mubr.msk.f32.mxu0 %vm1017_vm0, %v1018_v1 }
 0x29e   :  { %789 = vmatmul.mubr.f32.gmra.mrb[16].mxu0 %v470_v30 }
 0x29f   :  { %791 = vmatprep.mubr.msk.f32.mxu0 %vm1017_vm0, %v1018_v1 }
 0x2a2   :  { %792 = vmatmul.mubr.f32.gmra.mrb[18].mxu0 %v471_v20 }
 0x365   :  { %v558_v22 = vpop.f32.mrb[10].mxu0 }
 0x366   :  { %v559_v23 = vadd.f32 %v613_v21, %v558_v22  ;;  %v781_v24 = vpop.f32.mrb[11].mxu0 }
 0x368   :  { %582 = vst [vmem:[#allocation11] sm:$0xff] %v559_v23 }
 0x369   :  { %v563_v25 = vpop.f32.mrb[12].mxu0 }
 0x36a   :  { %v564_v26 = vadd.f32 %v613_v21, %v563_v25  ;;  %v784_v27 = vpop.f32.mrb[13].mxu0 }
 0x36c   :  { %583 = vst [vmem:[#allocation11 + $0x8] sm:$0xff] %v564_v26 }
 0x36d   :  { %v568_v28 = vpop.f32.mrb[14].mxu0 }
 0x36e   :  { %v569_v29 = vadd.f32 %v613_v21, %v568_v28  ;;  %v787_v31 = vpop.f32.mrb[15].mxu0 }
 0x370   :  { %584 = vst [vmem:[#allocation11 + $0x10] sm:$0xff] %v569_v29 }
 0x371   :  { %v573_v32 = vpop.f32.mrb[16].mxu0 }
 0x372   :  { %v574_v0 = vadd.f32 %v613_v21, %v573_v32  ;;  %v790_v33 = vpop.f32.mrb[17].mxu0 }
 0x374   :  { %585 = vst [vmem:[#allocation11 + $0x18] sm:$0xff] %v574_v0 }
 0x375   :  { %v578_v1 = vpop.f32.mrb[18].mxu0 }
 0x376   :  { %v579_v34 = vadd.f32 %v613_v21, %v578_v1  ;;  %v793_v35 = vpop.f32.mrb[19].mxu0 }
 0x378   :  { %586 = vst [vmem:[#allocation11 + $0x20] sm:$0xff] %v579_v34 }
 0x379   :  { %990 = shalt.err (!%p987_p2)
}
 0x37a   :  { %s991_s30 = scalar_lea.hbm %s1198_s5, 640 }
 0x37b   :  { %p992_p3 = scmp.ne.s32.totalorder %s1198_s5, %s991_s30  ;;  %p995_p4 = scmp.lt.u32.totalorder %s991_s30, %s1198_s5 }
 0x37d   :  { %p997_p5 = pnand %p995_p4, %p992_p3 }
 0x37f   :  { %1000 = shalt.err (!%p997_p5)
}
 0x380   :  { %598 = dma.vmem_to_hbm [thread:$0]  %s593_s27, 640, %s1198_s5, [#allocation4], %s1012_s16, %s1012_s16, %s1013_s17  }
 0x381   :  { %1007 = dma.done.wait [#allocation4], 640  }
 0x382   :  { %1008 = vsyncadd [#allocation4], 4294966656 }
 0x383   :  { %602 = vsyncpa [#allocation3], 1 }
 0x384   :  { %603 = vsyncpa [#allocation6], 1 }
 0x385   :  { %604 = vsyncpa [#allocation9], 1 }
 0x386   :  { %605 = vsyncpa [#allocation4], 1 }

</bundles_post_ra>
